<compile_context>
chip_gen: v7x
topology: tpu7x:2x2x1
jax: 0.10.0
libtpu: 0.0.40
codegen_flags: <defaults>
</compile_context>

<pallas_src>
import math

import jax
import jax.numpy as jnp
from jax import lax
from jax.experimental import pallas as pl
from jax.experimental.pallas import tpu as pltpu

# ---- small config (n_embd=32, n_head=4 "H4" attention) ----
B = 2           # batch
T = 8           # sequence length (<= block_size)
C = 32          # n_embd
H = 4           # n_head
D = C // H      # head dim
CAUSAL = True

NEG_INF = float("-inf")
SOFTMAX_MASK = -1e30      # finite mask for the softmax path (NaN-proof)


def attn_kernel(x_ref, wqkv_ref, bqkv_ref, wp_ref, bp_ref, y_ref, att_ref):
    """Single grid step: whole batch, fused QKV, batched-over-B attention."""
    x = x_ref[...]                                                    # (B*T, C)

    # Fused QKV projection. Weights are pre-transposed in the wrapper, so this is
    # a plain x @ Wqkv^T without any in-kernel transpose.
    qkv = jnp.dot(x, wqkv_ref[...],
                  preferred_element_type=jnp.float32) + bqkv_ref[...]  # (B*T, 3C)

    scale = 1.0 / math.sqrt(D)
    q = qkv[:, 0 * C:1 * C] * scale          # fold 1/sqrt(D) into q once
    k = qkv[:, 1 * C:2 * C]
    v = qkv[:, 2 * C:3 * C]

    # Causal mask, shared across batch and heads.
    row = lax.broadcasted_iota(jnp.int32, (T, T), 0)
    col = lax.broadcasted_iota(jnp.int32, (T, T), 1)
    causal = (row >= col)[None]                                       # (1, T, T)

    head_outs = []
    for h in range(H):                       # static unroll over heads (H=4)
        # (B*T, D) -> (B, T, D): leading-dim split only (last dim unchanged).
        qh = q[:, h * D:(h + 1) * D].reshape(B, T, D)
        kh = k[:, h * D:(h + 1) * D].reshape(B, T, D)
        vh = v[:, h * D:(h + 1) * D].reshape(B, T, D)

        # Scores for all batch elements of this head in one batched einsum.
        s = jnp.einsum("btd,bsd->bts", qh, kh,
                       preferred_element_type=jnp.float32)            # (B, T, T)

        if CAUSAL:
            att_ref[h] = jnp.where(causal, s, NEG_INF)   # pre-softmax masked scores
            s_sm = jnp.where(causal, s, SOFTMAX_MASK)    # NaN-proof softmax path
        else:
            att_ref[h] = s
            s_sm = s

        # Numerically-stable softmax; reciprocal goes to the EUP slot.
        m = jnp.max(s_sm, axis=-1, keepdims=True)
        e = jnp.exp(s_sm - m)
        inv = pl.reciprocal(jnp.sum(e, axis=-1, keepdims=True), approx=True)
        p = e * inv

        o = jnp.einsum("bts,bsd->btd", p, vh,
                       preferred_element_type=jnp.float32)            # (B, T, D)
        head_outs.append(o.reshape(B * T, D))            # leading-dim fold only

    y = jnp.concatenate(head_outs, axis=-1)                           # (B*T, C)

    # Output projection (pre-transposed weight, no in-kernel .T).
    y = jnp.dot(y, wp_ref[...], preferred_element_type=jnp.float32) + bp_ref[...]
    y_ref[...] = y.astype(y_ref.dtype)


@jax.jit
def causal_self_attention(x, wq, bq, wk, bk, wv, bv, wp, bp):
    # Weight fusion / pre-transposition done once in the wrapper (outside the kernel).
    wqkv_t = jnp.concatenate([wq.T, wk.T, wv.T], axis=1)              # (C, 3C)
    bqkv = jnp.concatenate([bq, bk, bv], axis=1)                      # (1, 3C)
    wp_t = wp.T                                                       # (C, C)
    x_flat = x.reshape(B * T, C)

    y_flat, att_hb = pl.pallas_call(
        attn_kernel,
        out_shape=(
            jax.ShapeDtypeStruct((B * T, C), jnp.float32),
            jax.ShapeDtypeStruct((H, B, T, T), jnp.float32),
        ),
        grid_spec=pltpu.PrefetchScalarGridSpec(
            num_scalar_prefetch=0,
            grid=(1,),                                   # one step: whole batch at once
            in_specs=[
                pl.BlockSpec((B * T, C), lambda i: (0, 0)),           # x (flattened)
                pl.BlockSpec((C, 3 * C), lambda i: (0, 0)),           # fused Wqkv^T
                pl.BlockSpec((1, 3 * C), lambda i: (0, 0)),           # fused bqkv
                pl.BlockSpec((C, C), lambda i: (0, 0)),               # Wproj^T
                pl.BlockSpec((1, C), lambda i: (0, 0)),               # bproj
            ],
            out_specs=[
                pl.BlockSpec((B * T, C), lambda i: (0, 0)),           # y (flattened)
                pl.BlockSpec((H, B, T, T), lambda i: (0, 0, 0, 0)),   # att (head-major)
            ],
        ),
        compiler_params=pltpu.CompilerParams(
            dimension_semantics=("arbitrary",)),
    )(x_flat, wqkv_t, bqkv, wp_t, bp)

    y = y_flat.reshape(B, T, C)                          # free row-major reshape
    att = jnp.transpose(att_hb, (1, 0, 2, 3))            # (B, H, T, T), tiny XLA op
    return y, att


def reference(x, wq, bq, wk, bk, wv, bv, wp, bp):
    """Pure-JAX reference mirroring the PyTorch forward (eval mode)."""
    q = (x @ wq.T + bq[0]).reshape(B, T, H, D).transpose(0, 2, 1, 3)
    k = (x @ wk.T + bk[0]).reshape(B, T, H, D).transpose(0, 2, 1, 3)
    v = (x @ wv.T + bv[0]).reshape(B, T, H, D).transpose(0, 2, 1, 3)
    att = jnp.einsum("bhtd,bhsd->bhts", q, k) * (1.0 / math.sqrt(D))
    mask = jnp.tril(jnp.ones((T, T), dtype=bool))
    att = jnp.where(mask[None, None], att, NEG_INF)
    att_to_check = att
    p = jax.nn.softmax(att, axis=-1)
    y = jnp.einsum("bhts,bhsd->bhtd", p, v)
    y = y.transpose(0, 2, 1, 3).reshape(B, T, C)
    y = y @ wp.T + bp[0]
    return y, att_to_check


if __name__ == "__main__":
    key = jax.random.PRNGKey(0)
    ks = jax.random.split(key, 9)
    bound = 1.0 / math.sqrt(C)   # PyTorch nn.Linear default init range

    x  = jax.random.normal(ks[0], (B, T, C), jnp.float32)
    wq = jax.random.uniform(ks[1], (C, C), jnp.float32, -bound, bound)
    bq = jax.random.uniform(ks[2], (1, C), jnp.float32, -bound, bound)
    wk = jax.random.uniform(ks[3], (C, C), jnp.float32, -bound, bound)
    bk = jax.random.uniform(ks[4], (1, C), jnp.float32, -bound, bound)
    wv = jax.random.uniform(ks[5], (C, C), jnp.float32, -bound, bound)
    bv = jax.random.uniform(ks[6], (1, C), jnp.float32, -bound, bound)
    wp = jax.random.uniform(ks[7], (C, C), jnp.float32, -bound, bound)
    bp = jax.random.uniform(ks[8], (1, C), jnp.float32, -bound, bound)

    y, att = causal_self_attention(x, wq, bq, wk, bk, wv, bv, wp, bp)
    jax.block_until_ready((y, att))

    y_ref, att_ref = reference(x, wq, bq, wk, bk, wv, bv, wp, bp)
    # y: slightly looser tolerance because of the approximate (EUP) reciprocal.
    assert jnp.allclose(y, y_ref, atol=2e-3, rtol=2e-3)
    # att (pre-softmax masked scores): masked entries are -inf in both; compare
    # finite entries tightly.
    finite = jnp.isfinite(att_ref)
    assert jnp.array_equal(finite, jnp.isfinite(att))
    assert jnp.allclose(jnp.where(finite, att, 0.0),
                        jnp.where(finite, att_ref, 0.0), atol=1e-4, rtol=1e-4)

    print("KERNEL_OK")
</pallas_src>

<mosaic_0001>
module attributes {stable_mosaic.version = 11 : i64} {
  func.func @attn_kernel(%arg0: i32, %arg1: memref<16x32xf32, #tpu.memory_space<vmem>>, %arg2: memref<32x96xf32, #tpu.memory_space<vmem>>, %arg3: memref<1x96xf32, #tpu.memory_space<vmem>>, %arg4: memref<32x32xf32, #tpu.memory_space<vmem>>, %arg5: memref<1x32xf32, #tpu.memory_space<vmem>>, %arg6: memref<16x32xf32, #tpu.memory_space<vmem>>, %arg7: memref<4x2x8x8xf32, #tpu.memory_space<vmem>>) attributes {dimension_semantics = [#tpu.dimension_semantics<arbitrary>], iteration_bounds = array<i64: 1>, scalar_prefetch = 0 : i64, scratch_operands = 0 : i64, tpu.core_type = #tpu.core_type<tc>, window_params = [{pipeline_mode = #tpu.pipeline_mode<synchronous>, transform_indices = @transform_0, window_bounds = array<i64: 16, 32>}, {pipeline_mode = #tpu.pipeline_mode<synchronous>, transform_indices = @transform_1, window_bounds = array<i64: 32, 96>}, {pipeline_mode = #tpu.pipeline_mode<synchronous>, transform_indices = @transform_2, window_bounds = array<i64: 1, 96>}, {pipeline_mode = #tpu.pipeline_mode<synchronous>, transform_indices = @transform_3, window_bounds = array<i64: 32, 32>}, {pipeline_mode = #tpu.pipeline_mode<synchronous>, transform_indices = @transform_4, window_bounds = array<i64: 1, 32>}, {pipeline_mode = #tpu.pipeline_mode<synchronous>, transform_indices = @transform_5, window_bounds = array<i64: 16, 32>}, {pipeline_mode = #tpu.pipeline_mode<synchronous>, transform_indices = @transform_6, window_bounds = array<i64: 4, 2, 8, 8>}]} {
    %c0 = arith.constant 0 : index
    %c0_0 = arith.constant 0 : index
    %0 = vector.load %arg1[%c0, %c0_0] : memref<16x32xf32, #tpu.memory_space<vmem>>, vector<16x32xf32>
    %c0_1 = arith.constant 0 : index
    %c0_2 = arith.constant 0 : index
    %1 = vector.load %arg2[%c0_1, %c0_2] : memref<32x96xf32, #tpu.memory_space<vmem>>, vector<32x96xf32>
    %cst = arith.constant dense<0.000000e+00> : vector<16x96xf32>
    %2 = tpu.matmul %0, %1, %cst {dimension_numbers = #tpu.dot_dimension_numbers<[1], [0], [0], [1], [0, 0, 1, 1], [], []>} : vector<16x32xf32>, vector<32x96xf32>, vector<16x96xf32> -> vector<16x96xf32>
    %c0_3 = arith.constant 0 : index
    %c0_4 = arith.constant 0 : index
    %3 = vector.load %arg3[%c0_3, %c0_4] : memref<1x96xf32, #tpu.memory_space<vmem>>, vector<1x96xf32>
    %4 = vector.broadcast %3 : vector<1x96xf32> to vector<16x96xf32>
    %5 = arith.addf %2, %4 : vector<16x96xf32>
    %6 = vector.extract_strided_slice %5 {offsets = [0, 0], sizes = [16, 32], strides = [1, 1]} : vector<16x96xf32> to vector<16x32xf32>
    %cst_5 = arith.constant 0.353553385 : f32
    %7 = vector.broadcast %cst_5 : f32 to vector<16x32xf32>
    %8 = arith.mulf %6, %7 : vector<16x32xf32>
    %9 = vector.extract_strided_slice %5 {offsets = [0, 32], sizes = [16, 32], strides = [1, 1]} : vector<16x96xf32> to vector<16x32xf32>
    %10 = vector.extract_strided_slice %5 {offsets = [0, 64], sizes = [16, 32], strides = [1, 1]} : vector<16x96xf32> to vector<16x32xf32>
    %11 = tpu.iota {dimensions = array<i32: 0>} : vector<8x8xi32>
    %12 = tpu.iota {dimensions = array<i32: 1>} : vector<8x8xi32>
    %13 = arith.cmpi sge, %11, %12 : vector<8x8xi32>
    %14 = vector.shape_cast %13 : vector<8x8xi1> to vector<1x8x8xi1>
    %15 = vector.extract_strided_slice %8 {offsets = [0, 0], sizes = [16, 8], strides = [1, 1]} : vector<16x32xf32> to vector<16x8xf32>
    %16 = vector.shape_cast %15 : vector<16x8xf32> to vector<2x8x8xf32>
    %17 = vector.extract_strided_slice %9 {offsets = [0, 0], sizes = [16, 8], strides = [1, 1]} : vector<16x32xf32> to vector<16x8xf32>
    %18 = vector.shape_cast %17 : vector<16x8xf32> to vector<2x8x8xf32>
    %19 = vector.extract_strided_slice %10 {offsets = [0, 0], sizes = [16, 8], strides = [1, 1]} : vector<16x32xf32> to vector<16x8xf32>
    %20 = vector.shape_cast %19 : vector<16x8xf32> to vector<2x8x8xf32>
    "tpu.trace_start"() <{level = 10 : i32, message = "btd,bsd->bts"}> : () -> ()
    %cst_6 = arith.constant dense<0.000000e+00> : vector<2x8x8xf32>
    %21 = tpu.matmul %16, %18, %cst_6 {dimension_numbers = #tpu.dot_dimension_numbers<[2], [2], [1], [1], [0, 0, 0, 1, 1, 1], [0], [0]>} : vector<2x8x8xf32>, vector<2x8x8xf32>, vector<2x8x8xf32> -> vector<2x8x8xf32>
    %cst_7 = arith.constant 0xFF800000 : f32
    "tpu.trace_stop"() : () -> ()
    %22 = vector.shape_cast %14 : vector<1x8x8xi1> to vector<1x8x8xi1>
    %23 = vector.broadcast %22 : vector<1x8x8xi1> to vector<2x8x8xi1>
    %24 = vector.broadcast %cst_7 : f32 to vector<2x8x8xf32>
    %25 = arith.select %23, %21, %24 : vector<2x8x8xi1>, vector<2x8x8xf32>
    %c0_8 = arith.constant 0 : index
    %c0_9 = arith.constant 0 : index
    %c0_10 = arith.constant 0 : index
    %c0_11 = arith.constant 0 : index
    %26 = vector.load %arg7[%c0_8, %c0_9, %c0_10, %c0_11] : memref<4x2x8x8xf32, #tpu.memory_space<vmem>>, vector<1x2x8x8xf32>
    %27 = vector.shape_cast %26 : vector<1x2x8x8xf32> to vector<2x8x8xf32>
    %28 = vector.shape_cast %25 : vector<2x8x8xf32> to vector<1x2x8x8xf32>
    tpu.vector_store %arg7[%c0_8, %c0_9, %c0_10, %c0_11], %28 {strides = array<i32>} : memref<4x2x8x8xf32, #tpu.memory_space<vmem>>, vector<1x2x8x8xf32>,
    %cst_12 = arith.constant -1.000000e+30 : f32
    %29 = vector.shape_cast %14 : vector<1x8x8xi1> to vector<1x8x8xi1>
    %30 = vector.broadcast %29 : vector<1x8x8xi1> to vector<2x8x8xi1>
    %31 = vector.broadcast %cst_12 : f32 to vector<2x8x8xf32>
    %32 = arith.select %30, %21, %31 : vector<2x8x8xi1>, vector<2x8x8xf32>
    %cst_13 = arith.constant dense<0xFF800000> : vector<2x8xf32>
    %33 = vector.multi_reduction <maximumf>, %32, %cst_13 [2] : vector<2x8x8xf32> to vector<2x8xf32>
    %34 = vector.shape_cast %33 : vector<2x8xf32> to vector<2x8x1xf32>
    %35 = vector.broadcast %34 : vector<2x8x1xf32> to vector<2x8x8xf32>
    %36 = arith.subf %32, %35 : vector<2x8x8xf32>
    %37 = math.exp %36 : vector<2x8x8xf32>
    %cst_14 = arith.constant dense<0.000000e+00> : vector<2x8xf32>
    %38 = vector.multi_reduction <add>, %37, %cst_14 [2] : vector<2x8x8xf32> to vector<2x8xf32>
    %39 = vector.shape_cast %38 : vector<2x8xf32> to vector<2x8x1xf32>
    %40 = tpu.reciprocal %39 {approx = true} : vector<2x8x1xf32> -> vector<2x8x1xf32>
    %41 = vector.broadcast %40 : vector<2x8x1xf32> to vector<2x8x8xf32>
    %42 = arith.mulf %37, %41 : vector<2x8x8xf32>
    "tpu.trace_start"() <{level = 10 : i32, message = "bts,bsd->btd"}> : () -> ()
    %cst_15 = arith.constant dense<0.000000e+00> : vector<2x8x8xf32>
    %43 = tpu.matmul %42, %20, %cst_15 {dimension_numbers = #tpu.dot_dimension_numbers<[2], [1], [1], [2], [0, 0, 0, 1, 1, 2], [0], [0]>} : vector<2x8x8xf32>, vector<2x8x8xf32>, vector<2x8x8xf32> -> vector<2x8x8xf32>
    "tpu.trace_stop"() : () -> ()
    %44 = vector.shape_cast %43 : vector<2x8x8xf32> to vector<16x8xf32>
    %45 = vector.extract_strided_slice %8 {offsets = [0, 8], sizes = [16, 8], strides = [1, 1]} : vector<16x32xf32> to vector<16x8xf32>
    %46 = vector.shape_cast %45 : vector<16x8xf32> to vector<2x8x8xf32>
    %47 = vector.extract_strided_slice %9 {offsets = [0, 8], sizes = [16, 8], strides = [1, 1]} : vector<16x32xf32> to vector<16x8xf32>
    %48 = vector.shape_cast %47 : vector<16x8xf32> to vector<2x8x8xf32>
    %49 = vector.extract_strided_slice %10 {offsets = [0, 8], sizes = [16, 8], strides = [1, 1]} : vector<16x32xf32> to vector<16x8xf32>
    %50 = vector.shape_cast %49 : vector<16x8xf32> to vector<2x8x8xf32>
    "tpu.trace_start"() <{level = 10 : i32, message = "btd,bsd->bts"}> : () -> ()
    %cst_16 = arith.constant dense<0.000000e+00> : vector<2x8x8xf32>
    %51 = tpu.matmul %46, %48, %cst_16 {dimension_numbers = #tpu.dot_dimension_numbers<[2], [2], [1], [1], [0, 0, 0, 1, 1, 1], [0], [0]>} : vector<2x8x8xf32>, vector<2x8x8xf32>, vector<2x8x8xf32> -> vector<2x8x8xf32>
    %cst_17 = arith.constant 0xFF800000 : f32
    "tpu.trace_stop"() : () -> ()
    %52 = vector.shape_cast %14 : vector<1x8x8xi1> to vector<1x8x8xi1>
    %53 = vector.broadcast %52 : vector<1x8x8xi1> to vector<2x8x8xi1>
    %54 = vector.broadcast %cst_17 : f32 to vector<2x8x8xf32>
    %55 = arith.select %53, %51, %54 : vector<2x8x8xi1>, vector<2x8x8xf32>
    %c1 = arith.constant 1 : index
    %c0_18 = arith.constant 0 : index
    %c0_19 = arith.constant 0 : index
    %c0_20 = arith.constant 0 : index
    %56 = vector.load %arg7[%c1, %c0_18, %c0_19, %c0_20] : memref<4x2x8x8xf32, #tpu.memory_space<vmem>>, vector<1x2x8x8xf32>
    %57 = vector.shape_cast %56 : vector<1x2x8x8xf32> to vector<2x8x8xf32>
    %58 = vector.shape_cast %55 : vector<2x8x8xf32> to vector<1x2x8x8xf32>
    tpu.vector_store %arg7[%c1, %c0_18, %c0_19, %c0_20], %58 {strides = array<i32>} : memref<4x2x8x8xf32, #tpu.memory_space<vmem>>, vector<1x2x8x8xf32>,
    %cst_21 = arith.constant -1.000000e+30 : f32
    %59 = vector.shape_cast %14 : vector<1x8x8xi1> to vector<1x8x8xi1>
    %60 = vector.broadcast %59 : vector<1x8x8xi1> to vector<2x8x8xi1>
    %61 = vector.broadcast %cst_21 : f32 to vector<2x8x8xf32>
    %62 = arith.select %60, %51, %61 : vector<2x8x8xi1>, vector<2x8x8xf32>
    %cst_22 = arith.constant dense<0xFF800000> : vector<2x8xf32>
    %63 = vector.multi_reduction <maximumf>, %62, %cst_22 [2] : vector<2x8x8xf32> to vector<2x8xf32>
    %64 = vector.shape_cast %63 : vector<2x8xf32> to vector<2x8x1xf32>
    %65 = vector.broadcast %64 : vector<2x8x1xf32> to vector<2x8x8xf32>
    %66 = arith.subf %62, %65 : vector<2x8x8xf32>
    %67 = math.exp %66 : vector<2x8x8xf32>
    %cst_23 = arith.constant dense<0.000000e+00> : vector<2x8xf32>
    %68 = vector.multi_reduction <add>, %67, %cst_23 [2] : vector<2x8x8xf32> to vector<2x8xf32>
    %69 = vector.shape_cast %68 : vector<2x8xf32> to vector<2x8x1xf32>
    %70 = tpu.reciprocal %69 {approx = true} : vector<2x8x1xf32> -> vector<2x8x1xf32>
    %71 = vector.broadcast %70 : vector<2x8x1xf32> to vector<2x8x8xf32>
    %72 = arith.mulf %67, %71 : vector<2x8x8xf32>
    "tpu.trace_start"() <{level = 10 : i32, message = "bts,bsd->btd"}> : () -> ()
    %cst_24 = arith.constant dense<0.000000e+00> : vector<2x8x8xf32>
    %73 = tpu.matmul %72, %50, %cst_24 {dimension_numbers = #tpu.dot_dimension_numbers<[2], [1], [1], [2], [0, 0, 0, 1, 1, 2], [0], [0]>} : vector<2x8x8xf32>, vector<2x8x8xf32>, vector<2x8x8xf32> -> vector<2x8x8xf32>
    "tpu.trace_stop"() : () -> ()
    %74 = vector.shape_cast %73 : vector<2x8x8xf32> to vector<16x8xf32>
    %75 = vector.extract_strided_slice %8 {offsets = [0, 16], sizes = [16, 8], strides = [1, 1]} : vector<16x32xf32> to vector<16x8xf32>
    %76 = vector.shape_cast %75 : vector<16x8xf32> to vector<2x8x8xf32>
    %77 = vector.extract_strided_slice %9 {offsets = [0, 16], sizes = [16, 8], strides = [1, 1]} : vector<16x32xf32> to vector<16x8xf32>
    %78 = vector.shape_cast %77 : vector<16x8xf32> to vector<2x8x8xf32>
    %79 = vector.extract_strided_slice %10 {offsets = [0, 16], sizes = [16, 8], strides = [1, 1]} : vector<16x32xf32> to vector<16x8xf32>
    %80 = vector.shape_cast %79 : vector<16x8xf32> to vector<2x8x8xf32>
    "tpu.trace_start"() <{level = 10 : i32, message = "btd,bsd->bts"}> : () -> ()
    %cst_25 = arith.constant dense<0.000000e+00> : vector<2x8x8xf32>
    %81 = tpu.matmul %76, %78, %cst_25 {dimension_numbers = #tpu.dot_dimension_numbers<[2], [2], [1], [1], [0, 0, 0, 1, 1, 1], [0], [0]>} : vector<2x8x8xf32>, vector<2x8x8xf32>, vector<2x8x8xf32> -> vector<2x8x8xf32>
    %cst_26 = arith.constant 0xFF800000 : f32
    "tpu.trace_stop"() : () -> ()
    %82 = vector.shape_cast %14 : vector<1x8x8xi1> to vector<1x8x8xi1>
    %83 = vector.broadcast %82 : vector<1x8x8xi1> to vector<2x8x8xi1>
    %84 = vector.broadcast %cst_26 : f32 to vector<2x8x8xf32>
    %85 = arith.select %83, %81, %84 : vector<2x8x8xi1>, vector<2x8x8xf32>
    %c2 = arith.constant 2 : index
    %c0_27 = arith.constant 0 : index
    %c0_28 = arith.constant 0 : index
    %c0_29 = arith.constant 0 : index
    %86 = vector.load %arg7[%c2, %c0_27, %c0_28, %c0_29] : memref<4x2x8x8xf32, #tpu.memory_space<vmem>>, vector<1x2x8x8xf32>
    %87 = vector.shape_cast %86 : vector<1x2x8x8xf32> to vector<2x8x8xf32>
    %88 = vector.shape_cast %85 : vector<2x8x8xf32> to vector<1x2x8x8xf32>
    tpu.vector_store %arg7[%c2, %c0_27, %c0_28, %c0_29], %88 {strides = array<i32>} : memref<4x2x8x8xf32, #tpu.memory_space<vmem>>, vector<1x2x8x8xf32>,
    %cst_30 = arith.constant -1.000000e+30 : f32
    %89 = vector.shape_cast %14 : vector<1x8x8xi1> to vector<1x8x8xi1>
    %90 = vector.broadcast %89 : vector<1x8x8xi1> to vector<2x8x8xi1>
    %91 = vector.broadcast %cst_30 : f32 to vector<2x8x8xf32>
    %92 = arith.select %90, %81, %91 : vector<2x8x8xi1>, vector<2x8x8xf32>
    %cst_31 = arith.constant dense<0xFF800000> : vector<2x8xf32>
    %93 = vector.multi_reduction <maximumf>, %92, %cst_31 [2] : vector<2x8x8xf32> to vector<2x8xf32>
    %94 = vector.shape_cast %93 : vector<2x8xf32> to vector<2x8x1xf32>
    %95 = vector.broadcast %94 : vector<2x8x1xf32> to vector<2x8x8xf32>
    %96 = arith.subf %92, %95 : vector<2x8x8xf32>
    %97 = math.exp %96 : vector<2x8x8xf32>
    %cst_32 = arith.constant dense<0.000000e+00> : vector<2x8xf32>
    %98 = vector.multi_reduction <add>, %97, %cst_32 [2] : vector<2x8x8xf32> to vector<2x8xf32>
    %99 = vector.shape_cast %98 : vector<2x8xf32> to vector<2x8x1xf32>
    %100 = tpu.reciprocal %99 {approx = true} : vector<2x8x1xf32> -> vector<2x8x1xf32>
    %101 = vector.broadcast %100 : vector<2x8x1xf32> to vector<2x8x8xf32>
    %102 = arith.mulf %97, %101 : vector<2x8x8xf32>
    "tpu.trace_start"() <{level = 10 : i32, message = "bts,bsd->btd"}> : () -> ()
    %cst_33 = arith.constant dense<0.000000e+00> : vector<2x8x8xf32>
    %103 = tpu.matmul %102, %80, %cst_33 {dimension_numbers = #tpu.dot_dimension_numbers<[2], [1], [1], [2], [0, 0, 0, 1, 1, 2], [0], [0]>} : vector<2x8x8xf32>, vector<2x8x8xf32>, vector<2x8x8xf32> -> vector<2x8x8xf32>
    "tpu.trace_stop"() : () -> ()
    %104 = vector.shape_cast %103 : vector<2x8x8xf32> to vector<16x8xf32>
    %105 = vector.extract_strided_slice %8 {offsets = [0, 24], sizes = [16, 8], strides = [1, 1]} : vector<16x32xf32> to vector<16x8xf32>
    %106 = vector.shape_cast %105 : vector<16x8xf32> to vector<2x8x8xf32>
    %107 = vector.extract_strided_slice %9 {offsets = [0, 24], sizes = [16, 8], strides = [1, 1]} : vector<16x32xf32> to vector<16x8xf32>
    %108 = vector.shape_cast %107 : vector<16x8xf32> to vector<2x8x8xf32>
    %109 = vector.extract_strided_slice %10 {offsets = [0, 24], sizes = [16, 8], strides = [1, 1]} : vector<16x32xf32> to vector<16x8xf32>
    %110 = vector.shape_cast %109 : vector<16x8xf32> to vector<2x8x8xf32>
    "tpu.trace_start"() <{level = 10 : i32, message = "btd,bsd->bts"}> : () -> ()
    %cst_34 = arith.constant dense<0.000000e+00> : vector<2x8x8xf32>
    %111 = tpu.matmul %106, %108, %cst_34 {dimension_numbers = #tpu.dot_dimension_numbers<[2], [2], [1], [1], [0, 0, 0, 1, 1, 1], [0], [0]>} : vector<2x8x8xf32>, vector<2x8x8xf32>, vector<2x8x8xf32> -> vector<2x8x8xf32>
    %cst_35 = arith.constant 0xFF800000 : f32
    "tpu.trace_stop"() : () -> ()
    %112 = vector.shape_cast %14 : vector<1x8x8xi1> to vector<1x8x8xi1>
    %113 = vector.broadcast %112 : vector<1x8x8xi1> to vector<2x8x8xi1>
    %114 = vector.broadcast %cst_35 : f32 to vector<2x8x8xf32>
    %115 = arith.select %113, %111, %114 : vector<2x8x8xi1>, vector<2x8x8xf32>
    %c3 = arith.constant 3 : index
    %c0_36 = arith.constant 0 : index
    %c0_37 = arith.constant 0 : index
    %c0_38 = arith.constant 0 : index
    %116 = vector.load %arg7[%c3, %c0_36, %c0_37, %c0_38] : memref<4x2x8x8xf32, #tpu.memory_space<vmem>>, vector<1x2x8x8xf32>
    %117 = vector.shape_cast %116 : vector<1x2x8x8xf32> to vector<2x8x8xf32>
    %118 = vector.shape_cast %115 : vector<2x8x8xf32> to vector<1x2x8x8xf32>
    tpu.vector_store %arg7[%c3, %c0_36, %c0_37, %c0_38], %118 {strides = array<i32>} : memref<4x2x8x8xf32, #tpu.memory_space<vmem>>, vector<1x2x8x8xf32>,
    %cst_39 = arith.constant -1.000000e+30 : f32
    %119 = vector.shape_cast %14 : vector<1x8x8xi1> to vector<1x8x8xi1>
    %120 = vector.broadcast %119 : vector<1x8x8xi1> to vector<2x8x8xi1>
    %121 = vector.broadcast %cst_39 : f32 to vector<2x8x8xf32>
    %122 = arith.select %120, %111, %121 : vector<2x8x8xi1>, vector<2x8x8xf32>
    %cst_40 = arith.constant dense<0xFF800000> : vector<2x8xf32>
    %123 = vector.multi_reduction <maximumf>, %122, %cst_40 [2] : vector<2x8x8xf32> to vector<2x8xf32>
    %124 = vector.shape_cast %123 : vector<2x8xf32> to vector<2x8x1xf32>
    %125 = vector.broadcast %124 : vector<2x8x1xf32> to vector<2x8x8xf32>
    %126 = arith.subf %122, %125 : vector<2x8x8xf32>
    %127 = math.exp %126 : vector<2x8x8xf32>
    %cst_41 = arith.constant dense<0.000000e+00> : vector<2x8xf32>
    %128 = vector.multi_reduction <add>, %127, %cst_41 [2] : vector<2x8x8xf32> to vector<2x8xf32>
    %129 = vector.shape_cast %128 : vector<2x8xf32> to vector<2x8x1xf32>
    %130 = tpu.reciprocal %129 {approx = true} : vector<2x8x1xf32> -> vector<2x8x1xf32>
    %131 = vector.broadcast %130 : vector<2x8x1xf32> to vector<2x8x8xf32>
    %132 = arith.mulf %127, %131 : vector<2x8x8xf32>
    "tpu.trace_start"() <{level = 10 : i32, message = "bts,bsd->btd"}> : () -> ()
    %cst_42 = arith.constant dense<0.000000e+00> : vector<2x8x8xf32>
    %133 = tpu.matmul %132, %110, %cst_42 {dimension_numbers = #tpu.dot_dimension_numbers<[2], [1], [1], [2], [0, 0, 0, 1, 1, 2], [0], [0]>} : vector<2x8x8xf32>, vector<2x8x8xf32>, vector<2x8x8xf32> -> vector<2x8x8xf32>
    "tpu.trace_stop"() : () -> ()
    %134 = vector.shape_cast %133 : vector<2x8x8xf32> to vector<16x8xf32>
    %135 = tpu.concatenate %44, %74, %104, %134 in 1 : vector<16x8xf32>, vector<16x8xf32>, vector<16x8xf32>, vector<16x8xf32> -> vector<16x32xf32>
    %c0_43 = arith.constant 0 : index
    %c0_44 = arith.constant 0 : index
    %136 = vector.load %arg4[%c0_43, %c0_44] : memref<32x32xf32, #tpu.memory_space<vmem>>, vector<32x32xf32>
    %cst_45 = arith.constant dense<0.000000e+00> : vector<16x32xf32>
    %137 = tpu.matmul %135, %136, %cst_45 {dimension_numbers = #tpu.dot_dimension_numbers<[1], [0], [0], [1], [0, 0, 1, 1], [], []>} : vector<16x32xf32>, vector<32x32xf32>, vector<16x32xf32> -> vector<16x32xf32>
    %c0_46 = arith.constant 0 : index
    %c0_47 = arith.constant 0 : index
    %138 = vector.load %arg5[%c0_46, %c0_47] : memref<1x32xf32, #tpu.memory_space<vmem>>, vector<1x32xf32>
    %139 = vector.broadcast %138 : vector<1x32xf32> to vector<16x32xf32>
    %140 = arith.addf %137, %139 : vector<16x32xf32>
    %c0_48 = arith.constant 0 : index
    %c0_49 = arith.constant 0 : index
    %141 = vector.load %arg6[%c0_48, %c0_49] : memref<16x32xf32, #tpu.memory_space<vmem>>, vector<16x32xf32>
    tpu.vector_store %arg6[%c0_48, %c0_49], %140 {strides = array<i32>} : memref<16x32xf32, #tpu.memory_space<vmem>>, vector<16x32xf32>,
    return
  }
  func.func @transform_0(%arg0: i32) -> (i32, i32) {
    %c0_i32 = arith.constant 0 : i32
    %c0_i32_0 = arith.constant 0 : i32
    %c0_i32_1 = arith.constant 0 : i32
    return %c0_i32, %c0_i32_0 : i32, i32
  }
  func.func @transform_1(%arg0: i32) -> (i32, i32) {
    %c0_i32 = arith.constant 0 : i32
    %c0_i32_0 = arith.constant 0 : i32
    %c0_i32_1 = arith.constant 0 : i32
    return %c0_i32, %c0_i32_0 : i32, i32
  }
  func.func @transform_2(%arg0: i32) -> (i32, i32) {
    %c0_i32 = arith.constant 0 : i32
    %c0_i32_0 = arith.constant 0 : i32
    %c0_i32_1 = arith.constant 0 : i32
    return %c0_i32, %c0_i32_0 : i32, i32
  }
  func.func @transform_3(%arg0: i32) -> (i32, i32) {
    %c0_i32 = arith.constant 0 : i32
    %c0_i32_0 = arith.constant 0 : i32
    %c0_i32_1 = arith.constant 0 : i32
    return %c0_i32, %c0_i32_0 : i32, i32
  }
  func.func @transform_4(%arg0: i32) -> (i32, i32) {
    %c0_i32 = arith.constant 0 : i32
    %c0_i32_0 = arith.constant 0 : i32
    %c0_i32_1 = arith.constant 0 : i32
    return %c0_i32, %c0_i32_0 : i32, i32
  }
  func.func @transform_5(%arg0: i32) -> (i32, i32) {
    %c0_i32 = arith.constant 0 : i32
    %c0_i32_0 = arith.constant 0 : i32
    %c0_i32_1 = arith.constant 0 : i32
    return %c0_i32, %c0_i32_0 : i32, i32
  }
  func.func @transform_6(%arg0: i32) -> (i32, i32, i32, i32) {
    %c0_i32 = arith.constant 0 : i32
    %c0_i32_0 = arith.constant 0 : i32
    %c0_i32_1 = arith.constant 0 : i32
    %c0_i32_2 = arith.constant 0 : i32
    %c0_i32_3 = arith.constant 0 : i32
    return %c0_i32, %c0_i32_0, %c0_i32_1, %c0_i32_2 : i32, i32, i32, i32
  }
}

</mosaic_0001>

<bundles_post_ra>
// kernel: causal_self_attention.1
= control target key start
LH: loop header
LB: loop body
LE: loop exit
PB: predicated region body
PF: predicated region fallthrough
CT: control target
= control target key end

     0   :  { %vm36_vm0 = vcmask 261120   ;;  %s2207_s0 = inlined_call_operand.vmem [shape: f32[16,32], index: 0, kind: input, shape index: {}]   ;;  %s2208_s1 = inlined_call_operand.vmem [shape: f32[32,96], index: 1, kind: input, shape index: {}]   ;;  %s2209_s2 = inlined_call_operand.vmem [shape: f32[1,96], index: 2, kind: input, shape index: {}]   ;;  %s2210_s3 = inlined_call_operand.vmem [shape: f32[32,32], index: 3, kind: input, shape index: {}]   ;;  %s2211_s4 = inlined_call_operand.vmem [shape: f32[1,32], index: 4, kind: input, shape index: {}]   ;;  %s2212_s5 = inlined_call_operand.hbm [shape: f32[16,32], index: 5, kind: output, shape index: {0}]   ;;  %s2213_s6 = inlined_call_operand.vmem [shape: f32[4,2,8,8], index: 6, kind: output, shape index: {1}]  }
   0x1   :  { %v25_v0 = vld [vmem:[%s2208_s1] sm:$0xff]  ;;  %v26_v1 = vld [vmem:[%s2208_s1 + $0x8] sm:$0xff]  ;;  %v27_v2 = vld [vmem:[%s2208_s1 + $0x10] sm:$0xff] }
   0x2   :  { %v1803_v3 = vpack.c.bf16 %v26_v1, %v25_v0  ;;  %v28_v4 = vld [vmem:[%s2208_s1 + $0x18] sm:$0xff]  ;;  %v23_v5 = vld [vmem:[%s2207_s0] sm:$0xff] }
   0x3   :  { %v1807_v6 = vpack.c.bf16 %v28_v4, %v27_v2  ;;  %1709 = vmatprep.mubr.msk.f32.mxu0 %vm36_vm0, %v23_v5 }
   0x4   :  { %12 = vsyncpa [#allocation3], 0  ;;  %1804 = vmatprep.subr.bf16.mxu0 %v1803_v3  ;;  %v24_v7 = vld [vmem:[%s2207_s0 + $0x8] sm:$0xff]  ;;  %v1893_v8 = vmov 0.0   ;;  %vm1894_vm1 = vmmov 0   ;;  %s1895_s0 = smov 96   ;;  %v120_v18 = vlaneseq }
   0x5   :  { %1806 = vmatpush3.bf16.msra.mxu0 %v1803_v3  ;;  %1712 = vmatprep.subr.mxu1 %v1893_v8  ;;  %v1621_v9 = vld [vmem:[%s2209_s2] ss:$0 sm:$0xff]  ;;  %vm128_vm2 = vcmask 64512   ;;  %s1896_s13 = smov 64   ;;  %s1897_s14 = smov 88   ;;  %vm1504_vm4 = vcmask 195584  }
   0x6   :  { %1808 = vmatprep.subr.bf16.mxu0 %v1807_v6  ;;  %1714 = vmatprep.mubr.msk.f32.mxu1 %vm1894_vm1, %v1893_v8  ;;  %v121_v19 = vshrl.u32 %v120_v18, 7  ;;  %v123_v20 = vand.u32 127, %v120_v18  ;;  %s1898_s15 = smov 120   ;;  %s1899_s20 = smov 56   ;;  %vm1501_vm5 = vcmask 130048  }
   0x7   :  { %s1900_s21 = smov 112   ;;  %s1901_s22 = smov 80  }
   0x8   :  { %vm1999_vm3 = vcmp.ge.s32.totalorder %v121_v19, %v123_v20  ;;  %s1902_s27 = smov 48   ;;  %s1903_s28 = smov 72  }
   0x9   :  { %1810 = vmatpush3.bf16.msra.mxu0 %v1807_v6  ;;  %s1904_s29 = smov 104   ;;  %s1905_s9 = smov 40  }
   0xa   :  { %1732 = vmatprep.subr.mxu0 %v1893_v8  ;;  %s1907_s2 = smov 16   ;;  %s1908_s17 = smov 24  }
   0xb   :  { %s1909_s19 = smov [#allocation2]  }
   0xc   :  { %1710 = vmatmul.mubr.msk.f32.vlgmr.msra.gmra.mrb[0].mxu0 %vm36_vm0, %v24_v7 }
   0xd   :  { %1734 = vmatprep.mubr.msk.f32.mxu0 %vm1894_vm1, %v1893_v8 }
  0xdf   :  { %v1711_v10 = vpop.f32.mrb[0].mxu0 }
  0xe0   :  { %v109_v11 = vpop.f32.mrb[1].mxu0  ;;  %v1978_v13 = vadd.f32 %v1711_v10, %v1621_v9 }
  0xe1   :  { %v1975_v12 = vadd.f32 %v1621_v9, %v109_v11 }
  0xe2   :  { %v1992_v17 = vmul.f32 0.35355338, %v1978_v13 }
  0xe3   :  { %126 = vrot.lane.b32.xlu0 %v1975_v12, %s1895_s0  ;;  %v1984_v15 = vmul.f32 0.35355338, %v1975_v12 }
  0xe7   :  { %205 = vrot.lane.b32.xlu0 %v1978_v13, %s1895_s0  ;;  %s1906_s0 = smov 8  }
 0x155   :  { %v127_v14 = vpop.permute.xlu0 %126 }
 0x156   :  { %1713 = vmatpush3.xpose.msk.msra.mxu1 %vm128_vm2, %v127_v14 }
 0x157   :  { %1717 = vmatprep.subr.mxu1 %v1893_v8 }
 0x159   :  { %v206_v16 = vpop.permute.xlu0 %205  ;;  %1715 = vmatmul.mubr.msk.f32.vlgmr.msra.gmra.mrb[0].mxu1 %vm128_vm2, %v1984_v15 }
 0x15a   :  { %1718 = vmatpush3.xpose.msk.msra.mxu1 %vm128_vm2, %v206_v16  ;;  %1719 = vmatprep.mubr.msk.f32.mxu1 %vm1894_vm1, %v1893_v8 }
 0x15b   :  { %1722 = vmatprep.subr.mxu1 %v1893_v8 }
 0x15d   :  { %1720 = vmatmul.mubr.msk.f32.vlgmr.msra.gmra.mrb[2].mxu1 %vm128_vm2, %v1992_v17 }
 0x15e   :  { %1724 = vmatprep.mubr.msk.f32.mxu1 %vm1894_vm1, %v1893_v8 }
 0x22c   :  { %v200_v22 = vpop.f32.mrb[0].mxu1 }
 0x22d   :  { %v284_v23 = vsel %vm1999_vm3, %v200_v22, -inf  ;;  %v1716_v24 = vpop.f32.mrb[1].mxu1  ;;  %v288_v25 = vsel %vm1999_vm3, %v200_v22, -1e+30 }
 0x22e   :  { %286 = vst.msk [vmem:[%s2213_s6] sm:$0xff] %vm128_vm2, %v284_v23  ;;  %v290_v26 = vsel %vm128_vm2, %v288_v25, -inf }
 0x22f   :  { %291 = vmax.xlane.f32.xlu1 %v290_v26 }
 0x230   :  { %v278_v27 = vpop.f32.mrb[2].mxu1 }
 0x231   :  { %v285_v28 = vsel %vm1999_vm3, %v278_v27, -inf  ;;  %v1721_v29 = vpop.f32.mrb[3].mxu1  ;;  %v289_v30 = vsel %vm1999_vm3, %v278_v27, -1e+30 }
 0x232   :  { %287 = vst.msk [vmem:[%s2213_s6 + $0x8] sm:$0xff] %vm128_vm2, %v285_v28  ;;  %v293_v31 = vsel %vm128_vm2, %v289_v30, -inf }
 0x233   :  { %294 = vmax.xlane.f32.xlu1 %v293_v31 }
 0x244   :  { %312 = vrot.lane.b32.xlu1 %v1975_v12, %s1896_s13 }
 0x248   :  { %388 = vrot.lane.b32.xlu1 %v1978_v13, %s1896_s13 }
 0x24c   :  { %466 = vrot.lane.b32.xlu1 %v1975_v12, %s1897_s14 }
 0x250   :  { %544 = vrot.lane.b32.xlu1 %v1978_v13, %s1897_s14 }
 0x2bc   :  { %v292_v32 = vpop.xlane.xlu1 %291 }
 0x2bd   :  { %v296_v33 = vsub.f32 %v288_v25, %v292_v32 }
 0x2bf   :  { %v298_v34 = vmul.f32 1.442695, %v296_v33 }
 0x2c0   :  { %v295_v35 = vpop.xlane.xlu1 %294 }
 0x2c1   :  { %1837 = vpow2.f32 %v298_v34  ;;  %v297_v36 = vsub.f32 %v289_v30, %v295_v35 }
 0x2c3   :  { %v300_v37 = vmul.f32 1.442695, %v297_v36 }
 0x2c4   :  { %v313_v38 = vpop.permute.xlu1 %312 }
 0x2c5   :  { %1839 = vpow2.f32 %v300_v37  ;;  %1723 = vmatpush3.msra.mxu1 %v313_v38 }
 0x2c6   :  { %1727 = vmatprep.subr.mxu1 %v1893_v8 }
 0x2c8   :  { %v389_v39 = vpop.permute.xlu1 %388 }
 0x2cb   :  { %v1838_v40 = vpop.eup %1837 }
 0x2cc   :  { %v467_v41 = vpop.permute.xlu1 %466  ;;  %v302_v42 = vsel %vm128_vm2, %v1838_v40, 0.0 }
 0x2cd   :  { %303 = vadd.xlane.f32.xlu0 %v302_v42  ;;  %1733 = vmatpush3.xpose.msk.msra.mxu0 %vm128_vm2, %v467_v41 }
 0x2ce   :  { %1742 = vmatprep.subr.mxu0 %v1893_v8 }
 0x2cf   :  { %v1840_v43 = vpop.eup %1839 }
 0x2d0   :  { %v305_v44 = vsel %vm128_vm2, %v1840_v43, 0.0  ;;  %v545_v45 = vpop.permute.xlu1 %544 }
 0x2d1   :  { %306 = vadd.xlane.f32.xlu1 %v305_v44 }
 0x2e2   :  { %542 = vrot.lane.b32.xlu1 %v1992_v17, %s1898_s15 }
 0x2e3   :  { %464 = vrot.lane.b32.xlu0 %v1984_v15, %s1898_s15 }
 0x35a   :  { %v304_v46 = vpop.xlane.xlu0 %303 }
 0x35b   :  { %1841 = vrcp.f32 %v304_v46 }
 0x35e   :  { %v465_v47 = vpop.permute.xlu0 %464  ;;  %v307_v48 = vpop.xlane.xlu1 %306 }
 0x35f   :  { %1843 = vrcp.f32 %v307_v48  ;;  %1735 = vmatmul.mubr.msk.f32.vlgmr.msra.gmra.mrb[2].mxu0 %vm128_vm2, %v465_v47 }
 0x360   :  { %1744 = vmatprep.mubr.msk.f32.mxu0 %vm1894_vm1, %v1893_v8 }
 0x362   :  { %v543_v53 = vpop.permute.xlu1 %542 }
 0x365   :  { %v1842_v49 = vpop.eup %1841 }
 0x366   :  { %v310_v50 = vmul.f32 %v1842_v49, %v1838_v40 }
 0x368   :  { %1725 = vmatmul.mubr.msk.f32.vlgmr.msra.gmra.mrb[4].mxu1 %vm128_vm2, %v310_v50 }
 0x369   :  { %v1844_v51 = vpop.eup %1843  ;;  %1728 = vmatpush3.msra.mxu1 %v389_v39  ;;  %1729 = vmatprep.mubr.msk.f32.mxu1 %vm1894_vm1, %v1893_v8 }
 0x36a   :  { %v311_v52 = vmul.f32 %v1844_v51, %v1840_v43  ;;  %1737 = vmatprep.subr.mxu1 %v1893_v8 }
 0x36c   :  { %1730 = vmatmul.mubr.msk.f32.vlgmr.msra.gmra.mrb[6].mxu1 %vm128_vm2, %v311_v52 }
 0x36d   :  { %1739 = vmatprep.mubr.msk.f32.mxu1 %vm1894_vm1, %v1893_v8 }
 0x370   :  { %1738 = vmatpush3.xpose.msk.msra.mxu1 %vm128_vm2, %v545_v45 }
 0x371   :  { %1747 = vmatprep.subr.mxu1 %v1893_v8 }
 0x373   :  { %1740 = vmatmul.mubr.msk.f32.vlgmr.msra.gmra.mrb[8].mxu1 %vm128_vm2, %v543_v53 }
 0x374   :  { %1749 = vmatprep.mubr.msk.f32.mxu1 %vm1894_vm1, %v1893_v8 }
 0x432   :  { %v538_v54 = vpop.f32.mrb[2].mxu0 }
 0x433   :  { %v620_v55 = vsel %vm1999_vm3, %v538_v54, -inf  ;;  %v1736_v56 = vpop.f32.mrb[3].mxu0  ;;  %v625_v57 = vsel %vm1999_vm3, %v538_v54, -1e+30 }
 0x434   :  { %1634 = vst.msk [vmem:[%s2213_s6 + $0x10] sm:$0xff] %vm128_vm2, %v620_v55  ;;  %v627_v58 = vsel %vm128_vm2, %v625_v57, -inf }
 0x435   :  { %628 = vmax.xlane.f32.xlu1 %v627_v58 }
 0x43b   :  { %v2056_v59 = vpop.f32.mrb[4].mxu1 }
 0x43c   :  { %v1726_v60 = vpop.f32.mrb[5].mxu1 }
 0x43f   :  { %v2058_v61 = vpop.f32.mrb[6].mxu1 }
 0x440   :  { %v1731_v62 = vpop.f32.mrb[7].mxu1 }
 0x446   :  { %v616_v63 = vpop.f32.mrb[8].mxu1 }
 0x447   :  { %v621_v0 = vsel %vm1999_vm3, %v616_v63, -inf  ;;  %v1741_v1 = vpop.f32.mrb[9].mxu1  ;;  %v626_v2 = vsel %vm1999_vm3, %v616_v63, -1e+30 }
 0x448   :  { %1635 = vst.msk [vmem:[%s2213_s6 + $0x18] sm:$0xff] %vm128_vm2, %v621_v0  ;;  %v630_v3 = vsel %vm128_vm2, %v626_v2, -inf }
 0x449   :  { %631 = vmax.xlane.f32.xlu0 %v630_v3 }
 0x45f   :  { %725 = vrot.lane.b32.xlu0 %v1978_v13, %s1899_s20 }
 0x463   :  { %801 = vrot.lane.b32.xlu0 %v1984_v15, %s1900_s21 }
 0x4c2   :  { %v629_v4 = vpop.xlane.xlu1 %628 }
 0x4c3   :  { %v633_v5 = vsub.f32 %v625_v57, %v629_v4 }
 0x4c5   :  { %v635_v6 = vmul.f32 1.442695, %v633_v5 }
 0x4c7   :  { %1845 = vpow2.f32 %v635_v6 }
 0x4d1   :  { %v1846_v7 = vpop.eup %1845 }
 0x4d2   :  { %v639_v9 = vsel %vm128_vm2, %v1846_v7, 0.0 }
 0x4d3   :  { %640 = vadd.xlane.f32.xlu1 %v639_v9 }
 0x4d6   :  { %v632_v10 = vpop.xlane.xlu0 %631 }
 0x4d7   :  { %v634_v14 = vsub.f32 %v626_v2, %v632_v10 }
 0x4d9   :  { %v637_v16 = vmul.f32 1.442695, %v634_v14 }
 0x4da   :  { %v726_v11 = vpop.permute.xlu0 %725 }
 0x4db   :  { %1748 = vmatpush3.msra.mxu1 %v726_v11  ;;  %1847 = vpow2.f32 %v637_v16 }
 0x4dc   :  { %1757 = vmatprep.subr.mxu1 %v1893_v8 }
 0x4de   :  { %v802_v26 = vpop.permute.xlu0 %801 }
 0x4e4   :  { %649 = vrot.lane.b32.xlu1 %v1975_v12, %s1899_s20  ;;  %s1606_s20 = sshll.u32 %s1909_s19, 4  ;;  %s1607_s20 = int_to_ptr.vmem [resolvable:$true] %s1606_s20 }
 0x4e5   :  { %v1848_v18 = vpop.eup %1847  ;;  %p1874_p1 = scmp.lt.s32.totalorder %s1607_s20, %s1607_s20 }
 0x4e6   :  { %v642_v19 = vsel %vm128_vm2, %v1848_v18, 0.0 }
 0x4e8   :  { %803 = vrot.lane.b32.xlu1 %v1975_v12, %s1901_s22 }
 0x4ec   :  { %881 = vrot.lane.b32.xlu1 %v1978_v13, %s1901_s22 }
 0x510   :  { %643 = vadd.xlane.f32.xlu1 %v642_v19 }
 0x521   :  { %879 = vrot.lane.b32.xlu1 %v1992_v17, %s1900_s21  ;;  %s1869_s21 = scalar_lea.vmem %s1607_s20, 256 }
 0x522   :  { %p1870_p0 = scmp.ne.s32.totalorder %s1607_s20, %s1869_s21  ;;  %p1875_p2 = scmp.lt.s32.totalorder %s1869_s21, %s1869_s21 }
 0x524   :  { %p1876_p3 = por %p1875_p2, %p1874_p1 }
 0x526   :  { %p1877_p4 = pnand %p1876_p3, %p1870_p0 }
 0x560   :  { %v641_v20 = vpop.xlane.xlu1 %640 }
 0x561   :  { %1849 = vrcp.f32 %v641_v20 }
 0x564   :  { %v650_v22 = vpop.permute.xlu1 %649 }
 0x565   :  { %1743 = vmatpush3.msra.mxu0 %v650_v22 }
 0x566   :  { %1752 = vmatprep.subr.mxu0 %v1893_v8 }
 0x568   :  { %v804_v25 = vpop.permute.xlu1 %803 }
 0x56b   :  { %v1850_v23 = vpop.eup %1849 }
 0x56c   :  { %v647_v24 = vmul.f32 %v1850_v23, %v1846_v7  ;;  %v882_v27 = vpop.permute.xlu1 %881 }
 0x56e   :  { %1745 = vmatmul.mubr.msk.f32.vlgmr.msra.gmra.mrb[4].mxu0 %vm128_vm2, %v647_v24 }
 0x56f   :  { %1753 = vmatpush3.xpose.msk.msra.mxu0 %vm128_vm2, %v804_v25  ;;  %1754 = vmatprep.mubr.msk.f32.mxu0 %vm1894_vm1, %v1893_v8 }
 0x570   :  { %1762 = vmatprep.subr.mxu0 %v1893_v8 }
 0x572   :  { %1755 = vmatmul.mubr.msk.f32.vlgmr.msra.gmra.mrb[6].mxu0 %vm128_vm2, %v802_v26 }
 0x573   :  { %1764 = vmatprep.mubr.msk.f32.mxu0 %vm1894_vm1, %v1893_v8 }
 0x59d   :  { %v644_v28 = vpop.xlane.xlu1 %643 }
 0x59e   :  { %1851 = vrcp.f32 %v644_v28 }
 0x5a1   :  { %v880_v31 = vpop.permute.xlu1 %879 }
 0x5a8   :  { %v1852_v29 = vpop.eup %1851 }
 0x5a9   :  { %v648_v30 = vmul.f32 %v1852_v29, %v1848_v18 }
 0x5ab   :  { %1750 = vmatmul.mubr.msk.f32.vlgmr.msra.gmra.mrb[10].mxu1 %vm128_vm2, %v648_v30 }
 0x5ac   :  { %1758 = vmatpush3.xpose.msk.msra.mxu1 %vm128_vm2, %v882_v27  ;;  %1759 = vmatprep.mubr.msk.f32.mxu1 %vm1894_vm1, %v1893_v8 }
 0x5ad   :  { %1767 = vmatprep.subr.mxu1 %v1893_v8 }
 0x5af   :  { %1760 = vmatmul.mubr.msk.f32.vlgmr.msra.gmra.mrb[12].mxu1 %vm128_vm2, %v880_v31 }
 0x5b0   :  { %1769 = vmatprep.mubr.msk.f32.mxu1 %vm1894_vm1, %v1893_v8 }
 0x641   :  { %v2095_v32 = vpop.f32.mrb[4].mxu0 }
 0x642   :  { %v1746_v33 = vpop.f32.mrb[5].mxu0 }
 0x645   :  { %v875_v34 = vpop.f32.mrb[6].mxu0 }
 0x646   :  { %v957_v35 = vsel %vm1999_vm3, %v875_v34, -inf  ;;  %v1756_v36 = vpop.f32.mrb[7].mxu0  ;;  %v962_v37 = vsel %vm1999_vm3, %v875_v34, -1e+30 }
 0x647   :  { %1642 = vst.msk [vmem:[%s2213_s6 + $0x20] sm:$0xff] %vm128_vm2, %v957_v35  ;;  %v964_v38 = vsel %vm128_vm2, %v962_v37, -inf }
 0x648   :  { %965 = vmax.xlane.f32.xlu0 %v964_v38 }
 0x67e   :  { %v2106_v39 = vpop.f32.mrb[10].mxu1 }
 0x67f   :  { %v1751_v40 = vpop.f32.mrb[11].mxu1 }
 0x680   :  { %v1509_v40 = vld [vmem:[%s2210_s3 + $0x10] sm:$0xff] }
 0x682   :  { %v953_v41 = vpop.f32.mrb[12].mxu1 }
 0x683   :  { %v958_v42 = vsel %vm1999_vm3, %v953_v41, -inf  ;;  %v1761_v43 = vpop.f32.mrb[13].mxu1  ;;  %v963_v44 = vsel %vm1999_vm3, %v953_v41, -1e+30 }
 0x684   :  { %1643 = vst.msk [vmem:[%s2213_s6 + $0x28] sm:$0xff] %vm128_vm2, %v958_v42  ;;  %v967_v45 = vsel %vm128_vm2, %v963_v44, -inf  ;;  %v1510_v42 = vld [vmem:[%s2210_s3 + $0x18] sm:$0xff] }
 0x685   :  { %968 = vmax.xlane.f32.xlu1 %v967_v45  ;;  %v1815_v43 = vpack.c.bf16 %v1510_v42, %v1509_v40 }
 0x696   :  { %986 = vrot.lane.b32.xlu1 %v1975_v12, %s1902_s27 }
 0x69a   :  { %1140 = vrot.lane.b32.xlu1 %v1975_v12, %s1903_s28 }
 0x69e   :  { %1218 = vrot.lane.b32.xlu1 %v1978_v13, %s1903_s28 }
 0x6a2   :  { %1216 = vrot.lane.b32.xlu1 %v1992_v17, %s1904_s29 }
 0x6d5   :  { %v966_v46 = vpop.xlane.xlu0 %965 }
 0x6d6   :  { %v970_v47 = vsub.f32 %v962_v37, %v966_v46 }
 0x6d8   :  { %v972_v48 = vmul.f32 1.442695, %v970_v47 }
 0x6da   :  { %1853 = vpow2.f32 %v972_v48 }
 0x6e4   :  { %v1854_v49 = vpop.eup %1853 }
 0x6e5   :  { %v976_v50 = vsel %vm128_vm2, %v1854_v49, 0.0 }
 0x6e6   :  { %977 = vadd.xlane.f32.xlu0 %v976_v50 }
 0x6fc   :  { %1062 = vrot.lane.b32.xlu0 %v1978_v13, %s1902_s27 }
 0x712   :  { %v969_v51 = vpop.xlane.xlu1 %968 }
 0x713   :  { %v971_v52 = vsub.f32 %v963_v44, %v969_v51 }
 0x715   :  { %v974_v53 = vmul.f32 1.442695, %v971_v52 }
 0x716   :  { %v987_v54 = vpop.permute.xlu1 %986 }
 0x717   :  { %1855 = vpow2.f32 %v974_v53  ;;  %1763 = vmatpush3.msra.mxu0 %v987_v54 }
 0x718   :  { %1772 = vmatprep.subr.mxu0 %v1893_v8 }
 0x71a   :  { %v1141_v62 = vpop.permute.xlu1 %1140 }
 0x71e   :  { %v1219_v1 = vpop.permute.xlu1 %1218 }
 0x721   :  { %v1856_v55 = vpop.eup %1855 }
 0x722   :  { %v979_v17 = vsel %vm128_vm2, %v1856_v55, 0.0  ;;  %v1217_v3 = vpop.permute.xlu1 %1216 }
 0x723   :  { %980 = vadd.xlane.f32.xlu0 %v979_v17 }
 0x739   :  { %1138 = vrot.lane.b32.xlu0 %v1984_v15, %s1904_s29 }
 0x773   :  { %v978_v56 = vpop.xlane.xlu0 %977 }
 0x774   :  { %1857 = vrcp.f32 %v978_v56 }
 0x777   :  { %v1063_v57 = vpop.permute.xlu0 %1062 }
 0x778   :  { %1768 = vmatpush3.msra.mxu1 %v1063_v57 }
 0x779   :  { %1777 = vmatprep.subr.mxu1 %v1893_v8 }
 0x77e   :  { %v1858_v58 = vpop.eup %1857 }
 0x77f   :  { %v984_v60 = vmul.f32 %v1858_v58, %v1854_v49 }
 0x781   :  { %1765 = vmatmul.mubr.msk.f32.vlgmr.msra.gmra.mrb[8].mxu0 %vm128_vm2, %v984_v60 }
 0x782   :  { %1773 = vmatpush3.xpose.msk.msra.mxu0 %vm128_vm2, %v1141_v62  ;;  %1774 = vmatprep.mubr.msk.f32.mxu0 %vm1894_vm1, %v1893_v8 }
 0x783   :  { %1782 = vmatprep.subr.mxu0 %v1893_v8 }
 0x7b0   :  { %v981_v63 = vpop.xlane.xlu0 %980 }
 0x7b1   :  { %1859 = vrcp.f32 %v981_v63 }
 0x7b4   :  { %v1139_v15 = vpop.permute.xlu0 %1138 }
 0x7b5   :  { %1775 = vmatmul.mubr.msk.f32.vlgmr.msra.gmra.mrb[10].mxu0 %vm128_vm2, %v1139_v15 }
 0x7b6   :  { %1784 = vmatprep.mubr.msk.f32.mxu0 %vm1894_vm1, %v1893_v8 }
 0x7bb   :  { %v1860_v0 = vpop.eup %1859 }
 0x7bc   :  { %v985_v2 = vmul.f32 %v1860_v0, %v1856_v55 }
 0x7be   :  { %1770 = vmatmul.mubr.msk.f32.vlgmr.msra.gmra.mrb[14].mxu1 %vm128_vm2, %v985_v2 }
 0x7bf   :  { %1778 = vmatpush3.xpose.msk.msra.mxu1 %vm128_vm2, %v1219_v1  ;;  %1779 = vmatprep.mubr.msk.f32.mxu1 %vm1894_vm1, %v1893_v8 }
 0x7c0   :  { %1787 = vmatprep.subr.mxu1 %v1893_v8 }
 0x7c2   :  { %1780 = vmatmul.mubr.msk.f32.vlgmr.msra.gmra.mrb[16].mxu1 %vm128_vm2, %v1217_v3 }
 0x7c3   :  { %1789 = vmatprep.mubr.msk.f32.mxu1 %vm1894_vm1, %v1893_v8 }
 0x854   :  { %v1058_v4 = vpop.f32.mrb[8].mxu0 }
 0x855   :  { %v1766_v5 = vpop.f32.mrb[9].mxu0 }
 0x888   :  { %v1212_v6 = vpop.f32.mrb[10].mxu0 }
 0x889   :  { %v1294_v7 = vsel %vm1999_vm3, %v1212_v6, -inf  ;;  %v1776_v9 = vpop.f32.mrb[11].mxu0  ;;  %v1299_v10 = vsel %vm1999_vm3, %v1212_v6, -1e+30 }
 0x88a   :  { %1650 = vst.msk [vmem:[%s2213_s6 + $0x30] sm:$0xff] %vm128_vm2, %v1294_v7  ;;  %v1301_v11 = vsel %vm128_vm2, %v1299_v10, -inf }
 0x88b   :  { %1302 = vmax.xlane.f32.xlu0 %v1301_v11 }
 0x891   :  { %v1134_v14 = vpop.f32.mrb[14].mxu1 }
 0x892   :  { %v1771_v8 = vpop.f32.mrb[15].mxu1 }
 0x895   :  { %v1290_v16 = vpop.f32.mrb[16].mxu1 }
 0x896   :  { %v1295_v18 = vsel %vm1999_vm3, %v1290_v16, -inf  ;;  %v1781_v19 = vpop.f32.mrb[17].mxu1  ;;  %v1300_v20 = vsel %vm1999_vm3, %v1290_v16, -1e+30 }
 0x897   :  { %1651 = vst.msk [vmem:[%s2213_s6 + $0x38] sm:$0xff] %vm128_vm2, %v1295_v18  ;;  %v1304_v22 = vsel %vm128_vm2, %v1300_v20, -inf }
 0x898   :  { %1305 = vmax.xlane.f32.xlu1 %v1304_v22 }
 0x8a9   :  { %1323 = vrot.lane.b32.xlu1 %v1975_v12, %s1905_s9 }
 0x8ad   :  { %1477 = vrot.lane.b32.xlu1 %v2095_v32, %s1906_s0 }
 0x8b1   :  { %1479 = vrot.lane.b32.xlu1 %v2106_v39, %s1906_s0  ;;  %v1507_v39 = vld [vmem:[%s2210_s3] sm:$0xff] }
 0x8b5   :  { %1487 = vrot.lane.b32.xlu1 %v1134_v14, %s1907_s2 }
 0x918   :  { %v1303_v21 = vpop.xlane.xlu0 %1302 }
 0x919   :  { %v1307_v23 = vsub.f32 %v1299_v10, %v1303_v21 }
 0x91b   :  { %v1309_v24 = vmul.f32 1.442695, %v1307_v23 }
 0x91d   :  { %1861 = vpow2.f32 %v1309_v24 }
 0x925   :  { %v1306_v25 = vpop.xlane.xlu1 %1305 }
 0x926   :  { %v1308_v26 = vsub.f32 %v1300_v20, %v1306_v25 }
 0x927   :  { %v1862_v27 = vpop.eup %1861 }
 0x928   :  { %v1311_v28 = vmul.f32 1.442695, %v1308_v26  ;;  %v1313_v29 = vsel %vm128_vm2, %v1862_v27, 0.0 }
 0x929   :  { %1314 = vadd.xlane.f32.xlu0 %v1313_v29  ;;  %v1324_v12 = vpop.permute.xlu1 %1323 }
 0x92a   :  { %1863 = vpow2.f32 %v1311_v28  ;;  %1783 = vmatpush3.msra.mxu0 %v1324_v12 }
 0x92d   :  { %v1478_v48 = vpop.permute.xlu1 %1477 }
 0x92e   :  { %v1499_v50 = vsel %vm128_vm2, %v2056_v59, %v1478_v48  ;;  %v1654_v59 = vld [vmem:[%s2211_s4] ss:$0 sm:$0xff] }
 0x931   :  { %v1480_v54 = vpop.permute.xlu1 %1479 }
 0x932   :  { %v1500_v17 = vsel %vm128_vm2, %v2058_v61, %v1480_v54 }
 0x934   :  { %v1864_v30 = vpop.eup %1863 }
 0x935   :  { %v1316_v31 = vsel %vm128_vm2, %v1864_v30, 0.0  ;;  %v1488_v55 = vpop.permute.xlu1 %1487 }
 0x936   :  { %1317 = vadd.xlane.f32.xlu0 %v1316_v31  ;;  %v1503_v56 = vsel %vm1501_vm5, %v1500_v17, %v1488_v55 }
 0x94c   :  { %1399 = vrot.lane.b32.xlu0 %v1978_v13, %s1905_s9  ;;  %v1508_v13 = vld [vmem:[%s2210_s3 + $0x8] sm:$0xff] }
 0x94d   :  { %v1811_v41 = vpack.c.bf16 %v1508_v13, %v1507_v39 }
 0x94f   :  { %1812 = vmatprep.subr.bf16.mxu0 %v1811_v41 }
 0x950   :  { %1485 = vrot.lane.b32.xlu0 %v1058_v4, %s1907_s2 }
 0x9b6   :  { %v1315_v32 = vpop.xlane.xlu0 %1314 }
 0x9b7   :  { %1865 = vrcp.f32 %v1315_v32 }
 0x9c1   :  { %v1866_v33 = vpop.eup %1865 }
 0x9c2   :  { %v1321_v34 = vmul.f32 %v1866_v33, %v1862_v27 }
 0x9c3   :  { %v1318_v35 = vpop.xlane.xlu0 %1317 }
 0x9c4   :  { %1867 = vrcp.f32 %v1318_v35  ;;  %1785 = vmatmul.mubr.msk.f32.vlgmr.msra.gmra.mrb[12].mxu0 %vm128_vm2, %v1321_v34 }
 0x9c5   :  { %1814 = vmatpush3.bf16.msra.mxu0 %v1811_v41 }
 0x9c6   :  { %1816 = vmatprep.subr.bf16.mxu0 %v1815_v43 }
 0x9c7   :  { %v1400_v36 = vpop.permute.xlu0 %1399 }
 0x9c8   :  { %1788 = vmatpush3.msra.mxu1 %v1400_v36 }
 0x9c9   :  { %1818 = vmatpush3.bf16.msra.mxu0 %v1815_v43 }
 0x9cb   :  { %v1486_v49 = vpop.permute.xlu0 %1485 }
 0x9cc   :  { %v1502_v51 = vsel %vm1501_vm5, %v1499_v50, %v1486_v49 }
 0x9ce   :  { %v1868_v37 = vpop.eup %1867 }
 0x9cf   :  { %v1322_v38 = vmul.f32 %v1868_v37, %v1864_v30 }
 0x9d1   :  { %1790 = vmatmul.mubr.msk.f32.vlgmr.msra.gmra.mrb[18].mxu1 %vm128_vm2, %v1322_v38 }
 0xa97   :  { %v1395_v44 = vpop.f32.mrb[12].mxu0 }
 0xa98   :  { %1493 = vrot.lane.b32.xlu0 %v1395_v44, %s1908_s17  ;;  %v1786_v45 = vpop.f32.mrb[13].mxu0 }
 0xaa4   :  { %v1471_v46 = vpop.f32.mrb[18].mxu1 }
 0xaa5   :  { %1495 = vrot.lane.b32.xlu1 %v1471_v46, %s1908_s17  ;;  %v1791_v47 = vpop.f32.mrb[19].mxu1 }
 0xb0a   :  { %v1494_v52 = vpop.permute.xlu0 %1493 }
 0xb0b   :  { %v1505_v53 = vsel %vm1504_vm4, %v1502_v51, %v1494_v52 }
 0xb0c   :  { %1800 = vmatprep.mubr.msk.f32.mxu0 %vm36_vm0, %v1505_v53 }
 0xb17   :  { %v1496_v57 = vpop.permute.xlu1 %1495 }
 0xb18   :  { %v1506_v58 = vsel %vm1504_vm4, %v1503_v56, %v1496_v57 }
 0xb19   :  { %1801 = vmatmul.mubr.msk.f32.vlgmr.msra.gmra.mrb[14].mxu0 %vm36_vm0, %v1506_v58 }
 0xbec   :  { %v1802_v60 = vpop.f32.mrb[14].mxu0 }
 0xbed   :  { %v1596_v62 = vadd.f32 %v1802_v60, %v1654_v59  ;;  %v1590_v63 = vpop.f32.mrb[15].mxu0 }
 0xbee   :  { %v1591_v15 = vadd.f32 %v1654_v59, %v1590_v63 }
 0xbef   :  { %1600 = vst.msk [vmem:[#allocation2 + $0x8] sm:$0xff] %vm36_vm0, %v1596_v62 }
 0xbf0   :  { %1599 = vst.msk [vmem:[#allocation2] sm:$0xff] %vm36_vm0, %v1591_v15 }
 0xbf1   :  { %1880 = shalt.err (!%p1877_p4)
}
 0xbf2   :  { %s1881_s23 = scalar_lea.hbm %s2212_s5, 256 }
 0xbf3   :  { %p1882_p5 = scmp.ne.s32.totalorder %s2212_s5, %s1881_s23  ;;  %p1885_p6 = scmp.lt.u32.totalorder %s1881_s23, %s2212_s5 }
 0xbf5   :  { %p1887_p7 = pnand %p1885_p6, %p1882_p5 }
 0xbf7   :  { %1890 = shalt.err (!%p1887_p7)
}
 0xbf8   :  { %s1910_s28 = smov 128  }
 0xbf9   :  { %1612 = dma.vmem_to_hbm [thread:$0]  %s1607_s20, 256, %s2212_s5, [#allocation3], %s1910_s28, %s1910_s28, %s1906_s0  }
 0xbfa   :  { %1891 = dma.done.wait [#allocation3], 256  }
 0xbfb   :  { %1892 = vsyncadd [#allocation3], 4294967040 }
 0xbfc   :  { %1620 = vsyncpa [#allocation3], 1 }

</bundles_post_ra>
